<compile_context>
chip_gen: v7x
topology: tpu7x:2x2x1
jax: 0.10.0
libtpu: 0.0.40
codegen_flags: <defaults>
</compile_context>

<pallas_src>
import functools

import jax
import jax.numpy as jnp
from jax.experimental import pallas as pl
from jax.experimental.pallas import tpu as pltpu

LANES = 128
# ~2 MiB per f32 input block (rows of 128 lanes).  Double-buffered masked-path
# footprint (pred + gt + int8 mask) is ~9 MiB, under v5e's default scoped VMEM.
# TODO(synk): raise to ~4 MiB on v7x (3.2 TB/s HBM) once chip-version gating
# via pltpu.get_tpu_info() is wired in.
_TARGET_ROWS = 4096


# --------------------------------------------------------------------------
# Kernels
# --------------------------------------------------------------------------
def _accumulate(acc_ref, diff):
    # diff: (block_rows, 128) with block_rows % 8 == 0 -> layout-free reshape
    # to (-1, 8, 128); the axis-0 sum is pure vreg (VPU) adds into the (8,128)
    # accumulator.  The single cross-lane reduce happens in the wrapper.
    acc_ref[...] += jnp.sum(diff.reshape(-1, 8, LANES), axis=0)


def _l1_sum_kernel(p_ref, g_ref, o_ref, acc_ref, *, r_dim, block_rows,
                   valid_rows_last):
    """grid = (P, R): per-partition sum(|p - g|) into an (8,128) partial."""
    r = pl.program_id(1)

    @pl.when(r == 0)
    def _():
        acc_ref[...] = jnp.zeros_like(acc_ref)

    def _diff():
        p = p_ref[...].astype(jnp.float32)
        g = g_ref[...].astype(jnp.float32)
        return jnp.abs(p - g)

    if valid_rows_last != block_rows:  # static: last row block is ragged
        @pl.when(r != r_dim - 1)
        def _():
            _accumulate(acc_ref, _diff())

        @pl.when(r == r_dim - 1)
        def _():
            d = _diff()
            row = jax.lax.broadcasted_iota(jnp.int32, d.shape, 0)
            # keep this a select: Pallas-padded rows may hold NaN/Inf garbage
            _accumulate(acc_ref, jnp.where(row < valid_rows_last, d, 0.0))
    else:
        _accumulate(acc_ref, _diff())

    @pl.when(r == r_dim - 1)
    def _():
        o_ref[...] = acc_ref[...]


def _l1_sum_masked_kernel(p_ref, g_ref, m_ref, o_ref, acc_ref, *, r_dim, c_dim,
                          block_rows, valid_rows_last):
    """grid = (B, R, C): per-image sum(m * |p - g|); mask block is C-invariant."""
    r = pl.program_id(1)
    c = pl.program_id(2)

    @pl.when((r == 0) & (c == 0))
    def _():
        acc_ref[...] = jnp.zeros_like(acc_ref)

    def _diff():
        p = p_ref[...].astype(jnp.float32)
        g = g_ref[...].astype(jnp.float32)
        # multiply (not select): exact for m in {0,1} and matches torch's
        # `pred * ~mask` NaN/Inf propagation for masked-out pixels.
        return jnp.abs(p - g) * m_ref[...].astype(jnp.float32)

    if valid_rows_last != block_rows:  # static: last row block is ragged
        @pl.when(r != r_dim - 1)
        def _():
            _accumulate(acc_ref, _diff())

        @pl.when(r == r_dim - 1)
        def _():
            d = _diff()
            row = jax.lax.broadcasted_iota(jnp.int32, d.shape, 0)
            _accumulate(acc_ref, jnp.where(row < valid_rows_last, d, 0.0))
    else:
        _accumulate(acc_ref, _diff())

    @pl.when((r == r_dim - 1) & (c == c_dim - 1))
    def _():
        o_ref[...] = acc_ref[...]


# --------------------------------------------------------------------------
# Wrapper helpers
# --------------------------------------------------------------------------
def _broadcastable_to(shape, target):
    if len(shape) > len(target):
        return False
    for s, t in zip(shape[::-1], target[::-1]):
        if s != 1 and s != t:
            return False
    return True


def _unmasked_sum(pred, gt):
    """sum(|pred - gt|) over all elements; Pallas handles the lane-dense bulk."""
    flat_p = pred.reshape(-1)
    flat_g = gt.reshape(-1)
    n = flat_p.shape[0]
    rows = n // LANES
    total = jnp.float32(0.0)
    used = 0

    if rows >= 8:
        n_part = 2 if rows >= 16 else 1          # 2 partitions -> both TCs on v7x
        rows_p = (rows // n_part // 8) * 8        # rows per partition, multiple of 8
        used = n_part * rows_p * LANES
        # Prefix slice + reshape; identity when used == n (common for images).
        # TODO(synk): confirm in HLO the ragged prefix slice stays a bitcast.
        p3 = flat_p[:used].reshape(n_part, rows_p, LANES)
        g3 = flat_g[:used].reshape(n_part, rows_p, LANES)

        br = min(rows_p, _TARGET_ROWS)            # multiple of 8
        r_dim = pl.cdiv(rows_p, br)
        valid_last = rows_p - (r_dim - 1) * br

        in_spec = pl.BlockSpec((None, br, LANES), lambda p, r: (p, r, 0))
        out_spec = pl.BlockSpec((None, 8, LANES), lambda p, r: (p, 0, 0))
        kern = functools.partial(_l1_sum_kernel, r_dim=r_dim, block_rows=br,
                                 valid_rows_last=valid_last)

        part = pl.pallas_call(
            kern,
            out_shape=jax.ShapeDtypeStruct((n_part, 8, LANES), jnp.float32),
            grid_spec=pltpu.PrefetchScalarGridSpec(
                num_scalar_prefetch=0,
                grid=(n_part, r_dim),
                in_specs=[in_spec, in_spec],
                out_specs=out_spec,
                scratch_shapes=[pltpu.VMEM((8, LANES), jnp.float32)],
            ),
            compiler_params=pltpu.CompilerParams(
                dimension_semantics=("parallel", "arbitrary")),
        )(p3, g3)
        total = total + jnp.sum(part)

    if used < n:  # leftover rows + <128-element tail, handled in plain jnp
        tp = flat_p[used:].astype(jnp.float32)
        tg = flat_g[used:].astype(jnp.float32)
        total = total + jnp.sum(jnp.abs(tp - tg))
    return total


def _masked_sum_per_image(pred, gt, mask_b1hw):
    """sum(m * |pred - gt|) with an un-broadcast per-image int8 mask."""
    B, C, H, W = pred.shape
    rows_img = (H * W) // LANES                   # multiple of 8 (checked by caller)
    p4 = pred.reshape(B, C, rows_img, LANES)
    g4 = gt.reshape(B, C, rows_img, LANES)
    m3 = mask_b1hw.reshape(B, rows_img, LANES).astype(jnp.int8)

    br = min(rows_img, _TARGET_ROWS)
    r_dim = pl.cdiv(rows_img, br)
    valid_last = rows_img - (r_dim - 1) * br

    pg_spec = pl.BlockSpec((None, None, br, LANES), lambda b, r, c: (b, c, r, 0))
    m_spec = pl.BlockSpec((None, br, LANES), lambda b, r, c: (b, r, 0))  # ignores c
    out_spec = pl.BlockSpec((None, 8, LANES), lambda b, r, c: (b, 0, 0))
    kern = functools.partial(_l1_sum_masked_kernel, r_dim=r_dim, c_dim=C,
                             block_rows=br, valid_rows_last=valid_last)

    part = pl.pallas_call(
        kern,
        out_shape=jax.ShapeDtypeStruct((B, 8, LANES), jnp.float32),
        grid_spec=pltpu.PrefetchScalarGridSpec(
            num_scalar_prefetch=0,
            grid=(B, r_dim, C),   # C innermost: mask block fetched once per (b, r)
            in_specs=[pg_spec, pg_spec, m_spec],
            out_specs=out_spec,
            scratch_shapes=[pltpu.VMEM((8, LANES), jnp.float32)],
        ),
        compiler_params=pltpu.CompilerParams(
            dimension_semantics=("parallel", "arbitrary", "arbitrary")),
    )(p4, g4, m3)
    return jnp.sum(part)


# --------------------------------------------------------------------------
# Public entry point
# --------------------------------------------------------------------------
@functools.partial(jax.jit, static_argnames=("mode",))
def l1_loss_pallas(pred_img, gt_img, motion_mask=None, mode=None):
    assert pred_img.shape == gt_img.shape
    n_elems = pred_img.size

    if motion_mask is None:
        return _unmasked_sum(pred_img, gt_img) / jnp.float32(n_elems)

    m_bool = motion_mask.astype(jnp.bool_)
    if mode == "static":
        m_bool = jnp.logical_not(m_bool)          # PyTorch: pred * ~motion_mask

    fast_ok = (
        pred_img.ndim == 4
        and (pred_img.shape[2] * pred_img.shape[3]) % (8 * LANES) == 0
        and _broadcastable_to(
            m_bool.shape,
            (pred_img.shape[0], 1, pred_img.shape[2], pred_img.shape[3]))
    )
    if fast_ok:
        B, _, H, W = pred_img.shape
        mask_b1hw = jnp.broadcast_to(m_bool, (B, 1, H, W))
        total = _masked_sum_per_image(pred_img, gt_img, mask_b1hw)
    else:
        # TODO(synk): odd spatial sizes (H*W % 1024 != 0) or per-channel masks
        # fall back to a fused XLA elementwise+reduce instead of Pallas.
        m = jnp.broadcast_to(m_bool, pred_img.shape).astype(jnp.float32)
        d = jnp.abs(pred_img.astype(jnp.float32) - gt_img.astype(jnp.float32))
        total = jnp.sum(d * m)

    # mean over ALL elements — matches torch (pred*m - gt*m).abs().mean(),
    # intentionally NOT normalized by the mask population.
    return total / jnp.float32(n_elems)


class L1Loss:
    """JAX/Pallas port of the PyTorch L1Loss module (no learnable params)."""

    def __init__(self, mode=None):
        self.mode = mode

    def __call__(self, pred_img, gt_img, iteration, motion_mask=None, **kwargs):
        if motion_mask is not None and self.mode in ("static", "dynamic"):
            return l1_loss_pallas(pred_img, gt_img, motion_mask, mode=self.mode)
        return l1_loss_pallas(pred_img, gt_img)


if __name__ == "__main__":
    key = jax.random.PRNGKey(0)
    k1, k2, k3 = jax.random.split(key, 3)

    # NCHW, small shapes (H*W = 1024 so the fast masked path is exercised)
    B, C, H, W = 2, 4, 32, 32
    pred = jax.random.normal(k1, (B, C, H, W), dtype=jnp.float32)
    gt = jax.random.normal(k2, (B, C, H, W), dtype=jnp.float32)
    motion_mask = jax.random.bernoulli(k3, 0.3, (B, 1, H, W))

    # plain path
    loss_mod = L1Loss()
    out = jax.block_until_ready(loss_mod(pred, gt, iteration=0))
    ref = jnp.mean(jnp.abs(pred - gt))
    assert jnp.allclose(out, ref, rtol=1e-5, atol=1e-5), (out, ref)

    # static-masked path
    loss_static = L1Loss(mode="static")
    out_s = jax.block_until_ready(
        loss_static(pred, gt, iteration=0, motion_mask=motion_mask))
    m_s = jnp.broadcast_to((~motion_mask).astype(jnp.float32), pred.shape)
    ref_s = jnp.mean(jnp.abs(pred * m_s - gt * m_s))
    assert jnp.allclose(out_s, ref_s, rtol=1e-5, atol=1e-5), (out_s, ref_s)

    # dynamic-masked path
    loss_dyn = L1Loss(mode="dynamic")
    out_d = jax.block_until_ready(
        loss_dyn(pred, gt, iteration=0, motion_mask=motion_mask))
    m_d = jnp.broadcast_to(motion_mask.astype(jnp.float32), pred.shape)
    ref_d = jnp.mean(jnp.abs(pred * m_d - gt * m_d))
    assert jnp.allclose(out_d, ref_d, rtol=1e-5, atol=1e-5), (out_d, ref_d)

    print("KERNEL_OK")
</pallas_src>

<mosaic_0001>
module attributes {stable_mosaic.version = 11 : i64} {
  func.func @_l1_sum_kernel(%arg0: i32, %arg1: i32, %arg2: memref<1x32x128xf32, #tpu.memory_space<vmem>>, %arg3: memref<1x32x128xf32, #tpu.memory_space<vmem>>, %arg4: memref<1x8x128xf32, #tpu.memory_space<vmem>>, %arg5: memref<8x128xf32, #tpu.memory_space<vmem>>) attributes {dimension_semantics = [#tpu.dimension_semantics<parallel>, #tpu.dimension_semantics<arbitrary>], iteration_bounds = array<i64: 2, 1>, scalar_prefetch = 0 : i64, scratch_operands = 1 : i64, tpu.core_type = #tpu.core_type<tc>, window_params = [{transform_indices = @transform_0, window_bounds = array<i64: 1, 32, 128>}, {transform_indices = @transform_1, window_bounds = array<i64: 1, 32, 128>}, {transform_indices = @transform_2, window_bounds = array<i64: 1, 8, 128>}]} {
    %c0_i32 = arith.constant 0 : i32
    %0 = arith.cmpi eq, %arg1, %c0_i32 : i32
    %1 = arith.extui %0 : i1 to i32
    %c0_i32_0 = arith.constant 0 : i32
    %2 = arith.cmpi ne, %1, %c0_i32_0 : i32
    scf.if %2 {
      %cst_12 = arith.constant 0.000000e+00 : f32
      %17 = vector.broadcast %cst_12 : f32 to vector<8x128xf32>
      %c0_13 = arith.constant 0 : index
      %c0_14 = arith.constant 0 : index
      %18 = vector.load %arg5[%c0_13, %c0_14] : memref<8x128xf32, #tpu.memory_space<vmem>>, vector<8x128xf32>
      tpu.vector_store %arg5[%c0_13, %c0_14], %17 {strides = array<i32>} : memref<8x128xf32, #tpu.memory_space<vmem>>, vector<8x128xf32>,
    } else {
    }
    %c0 = arith.constant 0 : index
    %c0_1 = arith.constant 0 : index
    %c0_2 = arith.constant 0 : index
    %3 = vector.load %arg2[%c0, %c0_1, %c0_2] : memref<1x32x128xf32, #tpu.memory_space<vmem>>, vector<1x32x128xf32>
    %4 = vector.shape_cast %3 : vector<1x32x128xf32> to vector<32x128xf32>
    %c0_3 = arith.constant 0 : index
    %c0_4 = arith.constant 0 : index
    %c0_5 = arith.constant 0 : index
    %5 = vector.load %arg3[%c0_3, %c0_4, %c0_5] : memref<1x32x128xf32, #tpu.memory_space<vmem>>, vector<1x32x128xf32>
    %6 = vector.shape_cast %5 : vector<1x32x128xf32> to vector<32x128xf32>
    %7 = arith.subf %4, %6 : vector<32x128xf32>
    %8 = math.absf %7 : vector<32x128xf32>
    %c0_6 = arith.constant 0 : index
    %c0_7 = arith.constant 0 : index
    %9 = vector.load %arg5[%c0_6, %c0_7] : memref<8x128xf32, #tpu.memory_space<vmem>>, vector<8x128xf32>
    %10 = vector.shape_cast %8 : vector<32x128xf32> to vector<4x8x128xf32>
    %cst = arith.constant dense<0.000000e+00> : vector<8x128xf32>
    %11 = vector.multi_reduction <add>, %10, %cst [0] : vector<4x8x128xf32> to vector<8x128xf32>
    %12 = arith.addf %9, %11 : vector<8x128xf32>
    %c0_8 = arith.constant 0 : index
    %c0_9 = arith.constant 0 : index
    %13 = vector.load %arg5[%c0_8, %c0_9] : memref<8x128xf32, #tpu.memory_space<vmem>>, vector<8x128xf32>
    tpu.vector_store %arg5[%c0_8, %c0_9], %12 {strides = array<i32>} : memref<8x128xf32, #tpu.memory_space<vmem>>, vector<8x128xf32>,
    %c0_i32_10 = arith.constant 0 : i32
    %14 = arith.cmpi eq, %arg1, %c0_i32_10 : i32
    %15 = arith.extui %14 : i1 to i32
    %c0_i32_11 = arith.constant 0 : i32
    %16 = arith.cmpi ne, %15, %c0_i32_11 : i32
    scf.if %16 {
      %c0_12 = arith.constant 0 : index
      %c0_13 = arith.constant 0 : index
      %17 = vector.load %arg5[%c0_12, %c0_13] : memref<8x128xf32, #tpu.memory_space<vmem>>, vector<8x128xf32>
      %c0_14 = arith.constant 0 : index
      %c0_15 = arith.constant 0 : index
      %c0_16 = arith.constant 0 : index
      %18 = vector.load %arg4[%c0_14, %c0_15, %c0_16] : memref<1x8x128xf32, #tpu.memory_space<vmem>>, vector<1x8x128xf32>
      %19 = vector.shape_cast %18 : vector<1x8x128xf32> to vector<8x128xf32>
      %20 = vector.shape_cast %17 : vector<8x128xf32> to vector<1x8x128xf32>
      tpu.vector_store %arg4[%c0_14, %c0_15, %c0_16], %20 {strides = array<i32>} : memref<1x8x128xf32, #tpu.memory_space<vmem>>, vector<1x8x128xf32>,
    } else {
    }
    return
  }
  func.func @transform_0(%arg0: i32, %arg1: i32) -> (i32, i32, i32) {
    %c0_i32 = arith.constant 0 : i32
    %c0_i32_0 = arith.constant 0 : i32
    return %arg0, %arg1, %c0_i32 : i32, i32, i32
  }
  func.func @transform_1(%arg0: i32, %arg1: i32) -> (i32, i32, i32) {
    %c0_i32 = arith.constant 0 : i32
    %c0_i32_0 = arith.constant 0 : i32
    return %arg0, %arg1, %c0_i32 : i32, i32, i32
  }
  func.func @transform_2(%arg0: i32, %arg1: i32) -> (i32, i32, i32) {
    %c0_i32 = arith.constant 0 : i32
    %c0_i32_0 = arith.constant 0 : i32
    %c0_i32_1 = arith.constant 0 : i32
    return %arg0, %c0_i32, %c0_i32_0 : i32, i32, i32
  }
}

</mosaic_0001>

<bundles_post_ra>
// kernel: l1_loss_pallas.1
= control target key start
LH: loop header
LB: loop body
LE: loop exit
PB: predicated region body
PF: predicated region fallthrough
CT: control target
= control target key end

     0   :  { %s400_s9 = smov 0   ;;  %s402_s10 = smov 0   ;;  %s436_s0 = inlined_call_operand.vmem [shape: f32[2,32,128], index: 0, kind: input, shape index: {}]   ;;  %s437_s1 = inlined_call_operand.vmem [shape: f32[2,32,128], index: 1, kind: input, shape index: {}]   ;;  %s438_s2 = inlined_call_operand.vmem [shape: f32[2,8,128], index: 2, kind: output, shape index: {}]  }
   0x1   :  { %s404_s11 = smov 0  }
   0x2 LB: > { %s24_s12 = sadd.s32 1, %s379_s10  ;;  %p327_p0 = scmp.ge.s32.totalorder %s383_s11, 1  ;;  %s383_s11 = sphi %s404_s11, %s12_s11   ;;  %s379_s10 = sphi %s402_s10, %s440_s10   ;;  %s375_s9 = sphi %s400_s9, %s439_s9  }
   0x3   : > { %p26_p1 = scmp.ge.s32.totalorder %s24_s12, 2  ;;  %p148_p2 = scmp.lt.s32.totalorder %s383_s11, 3 }
   0x5   : > { %s442_s12 = smov (%p26_p1, %s24_s12), 0  ;;  %p149_p3 = pnand %p327_p0, %p148_p2 }
   0x6   : > { %p183_p4 = scmp.lt.s32.totalorder (!%p149_p3), %s375_s9, 1 }
   0x7   : > { %152 = sbr.rel (%p149_p3) target bundleno = 30 (0x1e), region = 28 }
   0xe   : > { %s444_s9 = smov (!%p183_p4, %s375_s9), 1 }
   0xf   : > { %s335_s13 = sshll.u32 %s444_s9, 5  ;;  %s332_s20 = sshll.u32 %s444_s9, 3 }
  0x10   : > { %s190_s16 = scalar_lea.vmem %s436_s0, %s335_s13  ;;  %s200_s19 = scalar_lea.vmem %s437_s1, %s335_s13 }
  0x11   : > { %v211_v0 = vld [vmem:[%s190_s16] sm:$0xff]  ;;  %v212_v1 = vld [vmem:[%s190_s16 + $0x8] sm:$0xff]  ;;  %v213_v2 = vld [vmem:[%s190_s16 + $0x10] sm:$0xff]  ;;  %s205_s23 = scalar_lea.vmem %s438_s2, %s332_s20 }
  0x12   : > { %v214_v3 = vld [vmem:[%s190_s16 + $0x18] sm:$0xff]  ;;  %v215_v4 = vld [vmem:[%s200_s19] sm:$0xff]  ;;  %v216_v5 = vld [vmem:[%s200_s19 + $0x8] sm:$0xff] }
  0x13   : > { %v217_v6 = vld [vmem:[%s200_s19 + $0x10] sm:$0xff]  ;;  %v218_v7 = vld [vmem:[%s200_s19 + $0x18] sm:$0xff]  ;;  %v219_v8 = vsub.f32 %v211_v0, %v215_v4  ;;  %v220_v9 = vsub.f32 %v212_v1, %v216_v5 }
  0x14   : > { %v221_v10 = vsub.f32 %v213_v2, %v217_v6  ;;  %v222_v11 = vsub.f32 %v214_v3, %v218_v7 }
  0x15   : > { %v223_v12 = vand.u32 2147483647, %v219_v8  ;;  %v224_v13 = vand.u32 2147483647, %v220_v9 }
  0x16   : > { %v225_v14 = vand.u32 2147483647, %v221_v10  ;;  %v226_v15 = vand.u32 2147483647, %v222_v11 }
  0x17   : > { %v228_v16 = vadd.f32 %v224_v13, %v223_v12 }
  0x19   : > { %v229_v17 = vadd.f32 %v228_v16, %v225_v14 }
  0x1b   : > { %v230_v18 = vadd.f32 %v229_v17, %v226_v15 }
  0x1d   : > { %237 = vst [vmem:[%s205_s23] sm:$0xff] %v230_v18 }
  0x1e PF: > { %s12_s11 = sadd.s32 1, %s383_s11   ;;  %s439_s9 = smov %s379_s10 }
  0x1f   : > { %p9_p5 = scmp.ge.s32.totalorder %s12_s11, 4   ;;  %s440_s10 = smov %s442_s12 }
  0x21   :  { %11 = sbr.rel (!%p9_p5) target bundleno = 2 (0x2), region = 69 }

</bundles_post_ra>
